<compile_context>
chip_gen: v5e
topology: v5e:2x2
jax: 0.10.0
libtpu: 0.0.40
codegen_flags: <defaults>
</compile_context>

<pallas_src>
import jax
import jax.numpy as jnp
import numpy as np
from jax.experimental import pallas as pl
from jax.experimental.pallas import tpu as pltpu

LANE = 128
SUBLANE = 8
ROW_TILE = 512  # target adj row-tile size; clipped to the (padded) N for small graphs


def _round_up(x, m):
    return ((x + m - 1) // m) * m


def _pad2d(a, rows, cols):
    return jnp.pad(a, ((0, rows - a.shape[0]), (0, cols - a.shape[1])))


# ------------------------------ kernels ------------------------------------

def _linear_tanh_kernel(x_ref, w_ref, b_ref, o_ref):
    # o = tanh(x_tile @ W + b)   (MXU matmul + VPU add + EUP tanh)
    y = jnp.dot(x_ref[...], w_ref[...], preferred_element_type=jnp.float32)
    o_ref[...] = jnp.tanh(y + b_ref[...])


def _matmul_kernel(x_ref, w_ref, o_ref):
    # o = x_tile @ W   (used for the hoisted hidden @ W_gcn step)
    o_ref[...] = jnp.dot(x_ref[...], w_ref[...],
                         preferred_element_type=jnp.float32)


def _adj_prop_tanh_kernel(adj_ref, xw_ref, o_ref):
    # adj row tile arrives as bf16 (exact for {0,1}); cast in-register and
    # accumulate in f32 on the MXU. xw is resident in VMEM across all tiles.
    a = adj_ref[...].astype(jnp.float32)
    o_ref[...] = jnp.tanh(
        jnp.dot(a, xw_ref[...], preferred_element_type=jnp.float32))


# -------------------------- row-tiled wrappers ------------------------------

def _row_tiled_linear_tanh(x, w, b, tm):
    n, k = x.shape
    d = w.shape[1]
    return pl.pallas_call(
        _linear_tanh_kernel,
        out_shape=jax.ShapeDtypeStruct((n, d), jnp.float32),
        grid_spec=pl.GridSpec(
            grid=(n // tm,),
            in_specs=[
                pl.BlockSpec((tm, k), lambda i: (i, 0)),   # pipelined row tile
                pl.BlockSpec((k, d), lambda i: (0, 0)),    # weight, resident
                pl.BlockSpec((1, d), lambda i: (0, 0)),    # bias, resident
            ],
            out_specs=pl.BlockSpec((tm, d), lambda i: (i, 0)),
        ),
        compiler_params=pltpu.CompilerParams(
            dimension_semantics=("parallel",)),
    )(x, w, b)


def _row_tiled_matmul(x, w, tm):
    n, k = x.shape
    d = w.shape[1]
    return pl.pallas_call(
        _matmul_kernel,
        out_shape=jax.ShapeDtypeStruct((n, d), jnp.float32),
        grid_spec=pl.GridSpec(
            grid=(n // tm,),
            in_specs=[
                pl.BlockSpec((tm, k), lambda i: (i, 0)),   # pipelined row tile
                pl.BlockSpec((k, d), lambda i: (0, 0)),    # weight, resident
            ],
            out_specs=pl.BlockSpec((tm, d), lambda i: (i, 0)),
        ),
        compiler_params=pltpu.CompilerParams(
            dimension_semantics=("parallel",)),
    )(x, w)


def _adj_propagate_tanh(adj_bf16, xw, tm):
    n = adj_bf16.shape[0]
    d = xw.shape[1]
    return pl.pallas_call(
        _adj_prop_tanh_kernel,
        out_shape=jax.ShapeDtypeStruct((n, d), jnp.float32),
        grid_spec=pl.GridSpec(
            grid=(n // tm,),
            in_specs=[
                pl.BlockSpec((tm, n), lambda i: (i, 0)),   # pipelined adj row tile (bf16)
                pl.BlockSpec((n, d), lambda i: (0, 0)),    # xw stays VMEM-resident
            ],
            out_specs=pl.BlockSpec((tm, d), lambda i: (i, 0)),
        ),
        compiler_params=pltpu.CompilerParams(
            dimension_semantics=("parallel",)),
    )(adj_bf16, xw)


# --------------------------- params / forward -------------------------------

def glorot_init(key, input_dim, output_dim):
    # Mirrors PyTorch glorot_init: uniform(-r, r), r = sqrt(6/(in+out)).
    r = np.sqrt(6.0 / (input_dim + output_dim))
    return jax.random.uniform(key, (input_dim, output_dim), jnp.float32,
                              minval=-r, maxval=r)


def init_graph_cluster(key, num_layers, input_dim, hidden_dim, z_dim):
    keys = jax.random.split(key, num_layers + 5)

    def linear_init(kw, kb, fan_in, fan_out):
        # nn.Linear default init: U(-1/sqrt(fan_in), 1/sqrt(fan_in)).
        bound = 1.0 / np.sqrt(fan_in)
        w = jax.random.uniform(kw, (fan_in, fan_out), jnp.float32,
                               minval=-bound, maxval=bound)
        b = jax.random.uniform(kb, (fan_out,), jnp.float32,
                               minval=-bound, maxval=bound)
        return w, b

    w1, b1 = linear_init(keys[0], keys[1], input_dim, 128)
    w2, b2 = linear_init(keys[2], keys[3], 128, hidden_dim)
    gcn_ws = [glorot_init(keys[4 + l], hidden_dim, hidden_dim)
              for l in range(num_layers)]
    w_assign = glorot_init(keys[4 + num_layers], hidden_dim, z_dim)
    return dict(w1=w1, b1=b1, w2=w2, b2=b2, gcn_ws=gcn_ws, w_assign=w_assign)


def graph_cluster_forward(params, adj, X, row_tile=ROW_TILE):
    n, input_dim = X.shape
    hidden_dim = params["w2"].shape[1]
    z_dim = params["w_assign"].shape[1]

    # Row-tile size and padded node count (row tiles must be multiples of 8).
    if n <= row_tile:
        tm = _round_up(n, SUBLANE)
        n_pad = tm
    else:
        tm = row_tile
        n_pad = _round_up(n, tm)

    # Lane-pad every feature dim to 128 so matmuls and stores are lane-dense.
    k1 = _round_up(input_dim, LANE)
    h128 = 128                               # fc1 output already lane-aligned
    hp = _round_up(hidden_dim, LANE)
    zp = _round_up(z_dim, LANE)

    x_p = _pad2d(X.astype(jnp.float32), n_pad, k1)
    # adj as bf16: exact for {0,1} entries, halves HBM/VMEM bytes of the
    # dominant operand. (For a weighted/normalized adjacency, re-check the
    # low-precision error budget before doing this.)
    adj_p = _pad2d(adj.astype(jnp.float32), n_pad, n_pad).astype(jnp.bfloat16)

    w1 = _pad2d(params["w1"], k1, h128)
    b1 = jnp.pad(params["b1"], (0, h128 - params["b1"].shape[0])).reshape(1, h128)
    w2 = _pad2d(params["w2"], h128, hp)
    b2 = jnp.pad(params["b2"], (0, hp - params["b2"].shape[0])).reshape(1, hp)

    hidden = _row_tiled_linear_tanh(x_p, w1, b1, tm)      # [n_pad, 128]
    hidden = _row_tiled_linear_tanh(hidden, w2, b2, tm)   # [n_pad, hp]

    # GCN layers: hoist hidden @ W out of the adj hot loop, then propagate.
    for w in params["gcn_ws"]:
        xw = _row_tiled_matmul(hidden, _pad2d(w, hp, hp), tm)
        hidden = _adj_propagate_tanh(adj_p, xw, tm)

    # Assignment GCN layer.
    xw = _row_tiled_matmul(hidden, _pad2d(params["w_assign"], hp, zp), tm)
    assign = _adj_propagate_tanh(adj_p, xw, tm)

    return assign[:n, :z_dim]

# TODO(synk): optional block-sparse skipping of all-zero adj tiles via
# PrefetchScalarGridSpec is not implemented; dense bf16 adj is used instead.


def reference(params, adj, X):
    h = jnp.tanh(X @ params["w1"] + params["b1"])
    h = jnp.tanh(h @ params["w2"] + params["b2"])
    for w in params["gcn_ws"]:
        h = jnp.tanh(adj @ (h @ w))
    return jnp.tanh(adj @ (h @ params["w_assign"]))


if __name__ == "__main__":
    # Small shapes consistent with the module defaults:
    # hidden_dim=32, z_dim=32, n_layers=3; N graph nodes with small node features.
    N, input_dim, hidden_dim, z_dim, num_layers = 64, 16, 32, 32, 3

    key = jax.random.PRNGKey(0)
    k_adj, k_x, k_p = jax.random.split(key, 3)

    # Symmetric {0,1} "adjacency-like" matrix (sparse adj fed densely here).
    a = (jax.random.uniform(k_adj, (N, N)) < 0.15).astype(jnp.float32)
    adj = jnp.maximum(a, a.T)
    X = jax.random.normal(k_x, (N, input_dim), dtype=jnp.float32)
    params = init_graph_cluster(k_p, num_layers, input_dim, hidden_dim, z_dim)

    out = graph_cluster_forward(params, adj, X)
    out = jax.block_until_ready(out)

    ref = reference(params, adj, X)
    np.testing.assert_allclose(np.asarray(out), np.asarray(ref),
                               rtol=2e-4, atol=2e-4)
    print("KERNEL_OK")
</pallas_src>

<mosaic_0001>
module attributes {stable_mosaic.version = 11 : i64} {
  func.func @_linear_tanh_kernel(%arg0: i32, %arg1: memref<64x128xf32, #tpu.memory_space<vmem>>, %arg2: memref<128x128xf32, #tpu.memory_space<vmem>>, %arg3: memref<1x128xf32, #tpu.memory_space<vmem>>, %arg4: memref<64x128xf32, #tpu.memory_space<vmem>>) attributes {dimension_semantics = [#tpu.dimension_semantics<parallel>], iteration_bounds = array<i64: 1>, scalar_prefetch = 0 : i64, scratch_operands = 0 : i64, tpu.core_type = #tpu.core_type<tc>, window_params = [{transform_indices = @transform_0, window_bounds = array<i64: 64, 128>}, {pipeline_mode = #tpu.pipeline_mode<synchronous>, transform_indices = @transform_1, window_bounds = array<i64: 128, 128>}, {pipeline_mode = #tpu.pipeline_mode<synchronous>, transform_indices = @transform_2, window_bounds = array<i64: 1, 128>}, {transform_indices = @transform_3, window_bounds = array<i64: 64, 128>}]} {
    %c0 = arith.constant 0 : index
    %c0_0 = arith.constant 0 : index
    %0 = vector.load %arg1[%c0, %c0_0] : memref<64x128xf32, #tpu.memory_space<vmem>>, vector<64x128xf32>
    %c0_1 = arith.constant 0 : index
    %c0_2 = arith.constant 0 : index
    %1 = vector.load %arg2[%c0_1, %c0_2] : memref<128x128xf32, #tpu.memory_space<vmem>>, vector<128x128xf32>
    %cst = arith.constant dense<0.000000e+00> : vector<64x128xf32>
    %2 = tpu.matmul %0, %1, %cst {dimension_numbers = #tpu.dot_dimension_numbers<[1], [0], [0], [1], [0, 0, 1, 1], [], []>} : vector<64x128xf32>, vector<128x128xf32>, vector<64x128xf32> -> vector<64x128xf32>
    %c0_3 = arith.constant 0 : index
    %c0_4 = arith.constant 0 : index
    %3 = vector.load %arg3[%c0_3, %c0_4] : memref<1x128xf32, #tpu.memory_space<vmem>>, vector<1x128xf32>
    %4 = vector.broadcast %3 : vector<1x128xf32> to vector<64x128xf32>
    %5 = arith.addf %2, %4 : vector<64x128xf32>
    %6 = math.tanh %5 : vector<64x128xf32>
    %c0_5 = arith.constant 0 : index
    %c0_6 = arith.constant 0 : index
    %7 = vector.load %arg4[%c0_5, %c0_6] : memref<64x128xf32, #tpu.memory_space<vmem>>, vector<64x128xf32>
    tpu.vector_store %arg4[%c0_5, %c0_6], %6 {strides = array<i32>} : memref<64x128xf32, #tpu.memory_space<vmem>>, vector<64x128xf32>,
    return
  }
  func.func @transform_0(%arg0: i32) -> (i32, i32) {
    %c0_i32 = arith.constant 0 : i32
    %c0_i32_0 = arith.constant 0 : i32
    return %arg0, %c0_i32 : i32, i32
  }
  func.func @transform_1(%arg0: i32) -> (i32, i32) {
    %c0_i32 = arith.constant 0 : i32
    %c0_i32_0 = arith.constant 0 : i32
    %c0_i32_1 = arith.constant 0 : i32
    return %c0_i32, %c0_i32_0 : i32, i32
  }
  func.func @transform_2(%arg0: i32) -> (i32, i32) {
    %c0_i32 = arith.constant 0 : i32
    %c0_i32_0 = arith.constant 0 : i32
    %c0_i32_1 = arith.constant 0 : i32
    return %c0_i32, %c0_i32_0 : i32, i32
  }
  func.func @transform_3(%arg0: i32) -> (i32, i32) {
    %c0_i32 = arith.constant 0 : i32
    %c0_i32_0 = arith.constant 0 : i32
    return %arg0, %c0_i32 : i32, i32
  }
}

</mosaic_0001>

<bundles_post_ra>
// kernel: tpu_custom_call.1
= control target key start
LH: loop header
LB: loop body
LE: loop exit
PB: predicated region body
PF: predicated region fallthrough
CT: control target
= control target key end

     0   :  { %8 = vsyncpa [#allocation3], 0  ;;  %s346_s0 = inlined_call_operand.hbm [shape: f32[64,128], index: 0, kind: input, shape index: {}]   ;;  %s347_s1 = inlined_call_operand.hbm [shape: f32[128,128], index: 1, kind: input, shape index: {}]   ;;  %s348_s2 = inlined_call_operand.vmem [shape: f32[1,128], index: 2, kind: input, shape index: {}]   ;;  %s349_s3 = inlined_call_operand.hbm [shape: f32[64,128], index: 3, kind: output, shape index: {}]  }
   0x1   :  { %9 = vsyncpa [#allocation6], 0 }
   0x2   :  { %10 = vsyncpa [#allocation4], 0  ;;  %s15_s14 = sshll.u32 %s346_s0, 4  ;;  %s300_s15 = smov [#allocation2]   ;;  %s16_s14 = int_to_ptr.hbm [resolvable:$true] %s15_s14 }
   0x3   :  { %s17_s16 = sshll.u32 %s300_s15, 4  ;;  %s28_s19 = sshll.u32 %s347_s1, 4  ;;  %s18_s16 = int_to_ptr.vmem [resolvable:$true] %s17_s16  ;;  %s29_s19 = int_to_ptr.hbm [resolvable:$true] %s28_s19 }
   0x4   :  { %s301_s20 = smov 128   ;;  %s302_s21 = smov 8  }
   0x5   :  { %23 = dma.hbm_to_vmem [thread:$0]  %s16_s14, 1024, %s18_s16, [#allocation3], %s301_s20, %s301_s20, %s302_s21  }
   0x6   :  { %s303_s22 = smov [#allocation5]  }
   0x7   :  { %s30_s23 = sshll.u32 %s303_s22, 4  ;;  %s31_s23 = int_to_ptr.vmem [resolvable:$true] %s30_s23 }
   0x8   :  { %36 = dma.hbm_to_vmem [thread:$0]  %s29_s19, 2048, %s31_s23, [#allocation6], %s301_s20, %s301_s20, %s302_s21  }
   0x9   :  { %294 = dma.done.wait [#allocation3], 1024  }
   0xa   :  { %295 = vsyncadd [#allocation3], 4294966272 }
   0xb   :  { %296 = dma.done.wait [#allocation6], 2048  }
   0xc   :  { %297 = vsyncadd [#allocation6], 4294965248  ;;  %v70_v0 = vld [vmem:[#allocation5 + $0x78] sm:$0xff]  ;;  %v69_v1 = vld [vmem:[#allocation5 + $0x70] sm:$0xff]  ;;  %s138_s27 = sshll.u32 %s349_s3, 4  ;;  %s139_s27 = int_to_ptr.hbm [resolvable:$true] %s138_s27 }
   0xd   :  { %153 = vmatpush.msra.mxu2 %v70_v0  ;;  %154 = vmatpush.msra.mxu3 %v70_v0  ;;  %v68_v2 = vld [vmem:[#allocation5 + $0x68] sm:$0xff]  ;;  %v67_v3 = vld [vmem:[#allocation5 + $0x60] sm:$0xff]  ;;  %v66_v4 = vld [vmem:[#allocation5 + $0x58] sm:$0xff] }
   0xe   :  { %75 = vmatpush.msra.mxu0 %v70_v0  ;;  %152 = vmatpush.msra.mxu1 %v70_v0  ;;  %v65_v5 = vld [vmem:[#allocation5 + $0x50] sm:$0xff]  ;;  %v64_v6 = vld [vmem:[#allocation5 + $0x48] sm:$0xff]  ;;  %v63_v7 = vld [vmem:[#allocation5 + $0x40] sm:$0xff] }
   0xf   :  { %156 = vmatpush.msra.mxu2 %v69_v1  ;;  %157 = vmatpush.msra.mxu3 %v69_v1  ;;  %v62_v8 = vld [vmem:[#allocation5 + $0x38] sm:$0xff]  ;;  %v61_v9 = vld [vmem:[#allocation5 + $0x30] sm:$0xff]  ;;  %v60_v10 = vld [vmem:[#allocation5 + $0x28] sm:$0xff] }
  0x10   :  { %76 = vmatpush.msra.mxu0 %v69_v1  ;;  %155 = vmatpush.msra.mxu1 %v69_v1  ;;  %v59_v11 = vld [vmem:[#allocation5 + $0x20] sm:$0xff]  ;;  %v58_v12 = vld [vmem:[#allocation5 + $0x18] sm:$0xff]  ;;  %v57_v13 = vld [vmem:[#allocation5 + $0x10] sm:$0xff] }
  0x11   :  { %159 = vmatpush.msra.mxu2 %v68_v2  ;;  %160 = vmatpush.msra.mxu3 %v68_v2  ;;  %v56_v14 = vld [vmem:[#allocation5 + $0x8] sm:$0xff]  ;;  %v55_v15 = vld [vmem:[#allocation5] sm:$0xff]  ;;  %v53_v17 = vld [vmem:[#allocation2 + $0x30] sm:$0xff] }
  0x12   :  { %77 = vmatpush.msra.mxu0 %v68_v2  ;;  %158 = vmatpush.msra.mxu1 %v68_v2  ;;  %v51_v16 = vld [vmem:[#allocation2 + $0x20] sm:$0xff]  ;;  %v49_v19 = vld [vmem:[#allocation2 + $0x10] sm:$0xff]  ;;  %v52_v20 = vld [vmem:[#allocation2 + $0x28] sm:$0xff] }
  0x13   :  { %162 = vmatpush.msra.mxu2 %v67_v3  ;;  %163 = vmatpush.msra.mxu3 %v67_v3  ;;  %v47_v18 = vld [vmem:[#allocation2] sm:$0xff]  ;;  %v54_v21 = vld [vmem:[#allocation2 + $0x38] sm:$0xff]  ;;  %v48_v22 = vld [vmem:[#allocation2 + $0x8] sm:$0xff] }
  0x14   :  { %78 = vmatpush.msra.mxu0 %v67_v3  ;;  %161 = vmatpush.msra.mxu1 %v67_v3  ;;  %v50_v23 = vld [vmem:[#allocation2 + $0x18] sm:$0xff]  ;;  %v205_v24 = vld [vmem:[%s348_s2] ss:$0 sm:$0xff]  ;;  %s304_s2 = smov [#allocation7]  }
  0x15   :  { %165 = vmatpush.msra.mxu2 %v66_v4  ;;  %166 = vmatpush.msra.mxu3 %v66_v4  ;;  %s136_s24 = sshll.u32 %s304_s2, 4  ;;  %s137_s24 = int_to_ptr.vmem [resolvable:$true] %s136_s24 }
  0x16   :  { %79 = vmatpush.msra.mxu0 %v66_v4  ;;  %164 = vmatpush.msra.mxu1 %v66_v4 }
  0x17   :  { %168 = vmatpush.msra.mxu2 %v65_v5  ;;  %169 = vmatpush.msra.mxu3 %v65_v5 }
  0x18   :  { %80 = vmatpush.msra.mxu0 %v65_v5  ;;  %167 = vmatpush.msra.mxu1 %v65_v5 }
  0x19   :  { %171 = vmatpush.msra.mxu2 %v64_v6  ;;  %172 = vmatpush.msra.mxu3 %v64_v6 }
  0x1a   :  { %81 = vmatpush.msra.mxu0 %v64_v6  ;;  %170 = vmatpush.msra.mxu1 %v64_v6 }
  0x1b   :  { %174 = vmatpush.msra.mxu2 %v63_v7  ;;  %175 = vmatpush.msra.mxu3 %v63_v7 }
  0x1c   :  { %82 = vmatpush.msra.mxu0 %v63_v7  ;;  %173 = vmatpush.msra.mxu1 %v63_v7 }
  0x1d   :  { %177 = vmatpush.msra.mxu2 %v62_v8  ;;  %178 = vmatpush.msra.mxu3 %v62_v8 }
  0x1e   :  { %83 = vmatpush.msra.mxu0 %v62_v8  ;;  %176 = vmatpush.msra.mxu1 %v62_v8 }
  0x1f   :  { %180 = vmatpush.msra.mxu2 %v61_v9  ;;  %181 = vmatpush.msra.mxu3 %v61_v9 }
  0x20   :  { %84 = vmatpush.msra.mxu0 %v61_v9  ;;  %179 = vmatpush.msra.mxu1 %v61_v9 }
  0x21   :  { %183 = vmatpush.msra.mxu2 %v60_v10  ;;  %184 = vmatpush.msra.mxu3 %v60_v10 }
  0x22   :  { %85 = vmatpush.msra.mxu0 %v60_v10  ;;  %182 = vmatpush.msra.mxu1 %v60_v10 }
  0x23   :  { %186 = vmatpush.msra.mxu2 %v59_v11  ;;  %187 = vmatpush.msra.mxu3 %v59_v11 }
  0x24   :  { %86 = vmatpush.msra.mxu0 %v59_v11  ;;  %185 = vmatpush.msra.mxu1 %v59_v11 }
  0x25   :  { %189 = vmatpush.msra.mxu2 %v58_v12  ;;  %190 = vmatpush.msra.mxu3 %v58_v12 }
  0x26   :  { %87 = vmatpush.msra.mxu0 %v58_v12  ;;  %188 = vmatpush.msra.mxu1 %v58_v12 }
  0x27   :  { %192 = vmatpush.msra.mxu2 %v57_v13  ;;  %193 = vmatpush.msra.mxu3 %v57_v13 }
  0x28   :  { %88 = vmatpush.msra.mxu0 %v57_v13  ;;  %191 = vmatpush.msra.mxu1 %v57_v13 }
  0x29   :  { %195 = vmatpush.msra.mxu2 %v56_v14  ;;  %196 = vmatpush.msra.mxu3 %v56_v14 }
  0x2a   :  { %89 = vmatpush.msra.mxu0 %v56_v14  ;;  %194 = vmatpush.msra.mxu1 %v56_v14 }
  0x2b   :  { %198 = vmatpush.msra.mxu2 %v55_v15  ;;  %199 = vmatpush.msra.mxu3 %v55_v15 }
  0x2c   :  { %103 = vmatmul.f32.vlgmr.msra.gmra.mxu2 %v51_v16  ;;  %109 = vmatmul.f32.vlgmr.msra.gmra.mxu3 %v53_v17 }
  0x2d   :  { %90 = vmatpush.msra.mxu0 %v55_v15  ;;  %197 = vmatpush.msra.mxu1 %v55_v15 }
  0x2e   :  { %91 = vmatmul.f32.vlgmr.msra.gmra.mxu0 %v47_v18  ;;  %97 = vmatmul.f32.vlgmr.msra.gmra.mxu1 %v49_v19 }
  0x34   :  { %106 = vmatmul.f32.gmra.mxu2 %v52_v20  ;;  %112 = vmatmul.f32.gmra.mxu3 %v54_v21 }
  0x36   :  { %94 = vmatmul.f32.gmra.mxu0 %v48_v22  ;;  %100 = vmatmul.f32.gmra.mxu1 %v50_v23 }
  0xab   :  { %v92_v25 = vpop.f32.mrf.mxu0  ;;  %v98_v26 = vpop.f32.mrf.mxu1 }
  0xac   :  { %v93_v27 = vadd.f32 %v205_v24, %v92_v25  ;;  %v99_v28 = vadd.f32 %v205_v24, %v98_v26 }
  0xae   :  { %206 = vtanh.f32 %v93_v27 }
  0xaf   :  { %208 = vtanh.f32 %v99_v28  ;;  %v104_v29 = vpop.f32.mrf.mxu2  ;;  %v110_v30 = vpop.f32.mrf.mxu3 }
  0xb0   :  { %v105_v31 = vadd.f32 %v205_v24, %v104_v29  ;;  %v111_v32 = vadd.f32 %v205_v24, %v110_v30 }
  0xb2   :  { %210 = vtanh.f32 %v105_v31 }
  0xb3   :  { %212 = vtanh.f32 %v111_v32  ;;  %v95_v33 = vpop.f32.mrf.mxu0  ;;  %v101_v34 = vpop.f32.mrf.mxu1 }
  0xb4   :  { %v207_v35 = vpop.eup %206  ;;  %v96_v36 = vadd.f32 %v205_v24, %v95_v33  ;;  %v102_v37 = vadd.f32 %v205_v24, %v101_v34 }
  0xb5   :  { %v209_v38 = vpop.eup %208  ;;  %124 = vst [vmem:[#allocation7] sm:$0xff] %v207_v35 }
  0xb6   :  { %126 = vst [vmem:[#allocation7 + $0x10] sm:$0xff] %v209_v38  ;;  %214 = vtanh.f32 %v96_v36 }
  0xb7   :  { %216 = vtanh.f32 %v102_v37  ;;  %v107_v39 = vpop.f32.mrf.mxu2  ;;  %v113_v40 = vpop.f32.mrf.mxu3 }
  0xb8   :  { %v211_v41 = vpop.eup %210  ;;  %v108_v42 = vadd.f32 %v205_v24, %v107_v39  ;;  %v114_v43 = vadd.f32 %v205_v24, %v113_v40 }
  0xb9   :  { %v213_v44 = vpop.eup %212  ;;  %128 = vst [vmem:[#allocation7 + $0x20] sm:$0xff] %v211_v41 }
  0xba   :  { %130 = vst [vmem:[#allocation7 + $0x30] sm:$0xff] %v213_v44  ;;  %218 = vtanh.f32 %v108_v42 }
  0xbb   :  { %220 = vtanh.f32 %v114_v43 }
  0xbc   :  { %v215_v45 = vpop.eup %214 }
  0xbd   :  { %v217_v46 = vpop.eup %216  ;;  %125 = vst [vmem:[#allocation7 + $0x8] sm:$0xff] %v215_v45 }
  0xbe   :  { %127 = vst [vmem:[#allocation7 + $0x18] sm:$0xff] %v217_v46 }
  0xc0   :  { %v219_v47 = vpop.eup %218 }
  0xc1   :  { %v221_v48 = vpop.eup %220  ;;  %129 = vst [vmem:[#allocation7 + $0x28] sm:$0xff] %v219_v47 }
  0xc2   :  { %131 = vst [vmem:[#allocation7 + $0x38] sm:$0xff] %v221_v48 }
  0xc3   :  { %144 = dma.vmem_to_hbm [thread:$0]  %s137_s24, 1024, %s139_s27, [#allocation4], %s301_s20, %s301_s20, %s302_s21  }
  0xc4   :  { %298 = dma.done.wait [#allocation4], 1024  }
  0xc5   :  { %299 = vsyncadd [#allocation4], 4294966272 }
  0xc6   :  { %149 = vsyncpa [#allocation3], 1 }
  0xc7   :  { %150 = vsyncpa [#allocation6], 1 }
  0xc8   :  { %151 = vsyncpa [#allocation4], 1 }

</bundles_post_ra>
